<compile_context>
chip_gen: v6e
topology: v6e:2x2x1
jax: 0.10.0
libtpu: 0.0.40
codegen_flags: <defaults>
</compile_context>

<pallas_src>
import jax
import jax.numpy as jnp
from jax.experimental import pallas as pl
from jax.experimental.pallas import tpu as pltpu


def _round_up(x, m):
    return ((x + m - 1) // m) * m


def _pick_block_b(B, block_b):
    """Batch block: multiple of 8, >= 8, and >= 2 grid steps when possible."""
    bb = _round_up(max(1, min(block_b, B)), 8)
    # v7x megacore: if this would be a single grid step and there's room,
    # split in two so both TensorCores get work (costs one ~0.35us step).
    if _round_up(B, bb) // bb < 2 and bb >= 16:
        bb = _round_up((bb + 1) // 2, 8)
    return bb


def _mlp_kernel(word_ref, posc_ref, labc_ref,
                w_word_ref, w_pos_ref, w_lab_ref, b_hid_ref,
                w_out_ref, b_out_ref, out_ref):
    # Three accumulating MXU dots replace the fused matmul so no activation
    # concat is ever materialized (K = E / Vp / Vl are tiny; MXU has slack).
    h = jnp.dot(word_ref[...], w_word_ref[...], preferred_element_type=jnp.float32)
    h = h + jnp.dot(posc_ref[...], w_pos_ref[...], preferred_element_type=jnp.float32)
    h = h + jnp.dot(labc_ref[...], w_lab_ref[...], preferred_element_type=jnp.float32)
    y = jnp.maximum(h + b_hid_ref[...], 0.0)                 # f32 bias + ReLU
    out_ref[...] = (
        jnp.dot(y.astype(w_out_ref.dtype), w_out_ref[...],
                preferred_element_type=jnp.float32)
        + b_out_ref[...]
    ).astype(out_ref.dtype)


def fuse_params(params, compute_dtype=jnp.float32):
    """One-time parameter fusion (call once, not per step).

    The embedding tables are folded through their linear layers so the kernel
    never sees a gather: folded_pos[v] = pos_embeddings[v] @ W_pos.
    compute_dtype=jnp.bfloat16 halves weight/activation DMA and doubles MXU
    throughput on v6e/v7x (accumulation stays f32 in-kernel); it changes
    numerics vs the f32 reference.
    """
    folded_pos = params["pos_embeddings"] @ params["W_pos"]        # (Vp, H)
    folded_lab = params["lab_embeddings"] @ params["W_lab"]        # (Vl, H)
    b_hidden = params["b_word"] + params["b_pos"] + params["b_lab"]  # (1, H)
    return {
        "W_word": params["W_word"].astype(compute_dtype),
        "folded_pos": folded_pos.astype(compute_dtype),
        "folded_lab": folded_lab.astype(compute_dtype),
        "b_hidden": b_hidden.astype(jnp.float32),
        "W_out": params["W_out"].astype(compute_dtype),
        "b_out": params["b_out"].astype(jnp.float32),
    }


def action_predictor_forward(word_vec, pos_vec, lab_vec, fused, *, block_b=512):
    """word_vec: (B, E) f32; pos_vec/lab_vec: (B, S) int32; fused: fuse_params()."""
    compute_dtype = fused["W_word"].dtype
    Vp = fused["folded_pos"].shape[0]
    Vl = fused["folded_lab"].shape[0]

    # Mean-pooled embedding lookup rewritten as a (fractional) histogram:
    #   mean_j emb[id_j] @ W  ==  one_hot(ids).mean(1) @ (emb @ W)
    pos_frac = jax.nn.one_hot(pos_vec, Vp, dtype=jnp.float32).mean(axis=1)
    lab_frac = jax.nn.one_hot(lab_vec, Vl, dtype=jnp.float32).mean(axis=1)

    word = word_vec.astype(compute_dtype)
    pos_frac = pos_frac.astype(compute_dtype)
    lab_frac = lab_frac.astype(compute_dtype)

    B, E = word.shape
    H = fused["W_word"].shape[1]
    O = fused["W_out"].shape[1]

    bb = _pick_block_b(B, block_b)
    B_pad = _round_up(B, bb)
    if B_pad != B:
        # NOTE: padded rows compute relu(b_hidden) @ W_out + b_out (garbage);
        # they are sliced off below — never reduce over the padded output.
        pad = ((0, B_pad - B), (0, 0))
        word = jnp.pad(word, pad)
        pos_frac = jnp.pad(pos_frac, pad)
        lab_frac = jnp.pad(lab_frac, pad)

    out = pl.pallas_call(
        _mlp_kernel,
        out_shape=jax.ShapeDtypeStruct((B_pad, O), jnp.float32),
        grid=(B_pad // bb,),
        in_specs=[
            # Activations: blocked on the batch axis (Pallas double-buffers).
            pl.BlockSpec((bb, E), lambda i: (i, 0)),
            pl.BlockSpec((bb, Vp), lambda i: (i, 0)),
            pl.BlockSpec((bb, Vl), lambda i: (i, 0)),
            # Weights / biases: constant index map -> VMEM-resident across
            # the batch grid.
            # TODO(synk): at larger hidden/out dims add
            # pipeline_mode=pl.Buffered(1) here so constant operands are not
            # double-buffered (matters most on v7x's 64 MiB VMEM).
            pl.BlockSpec((E, H), lambda i: (0, 0)),
            pl.BlockSpec((Vp, H), lambda i: (0, 0)),
            pl.BlockSpec((Vl, H), lambda i: (0, 0)),
            pl.BlockSpec((1, H), lambda i: (0, 0)),
            pl.BlockSpec((H, O), lambda i: (0, 0)),
            pl.BlockSpec((1, O), lambda i: (0, 0)),
        ],
        # Output is stored unpadded (bb, O): masked vst on 16 lanes beats an
        # 8x-inflated padded writeback plus a de-pad slice kernel.
        out_specs=pl.BlockSpec((bb, O), lambda i: (i, 0)),
        compiler_params=pltpu.CompilerParams(
            dimension_semantics=("parallel",),   # megacore / v7x two TCs
        ),
    )(word, pos_frac, lab_frac,
      fused["W_word"], fused["folded_pos"], fused["folded_lab"],
      fused["b_hidden"], fused["W_out"], fused["b_out"])

    return out if B_pad == B else out[:B]


def _reference_forward(word_vec, pos_vec, lab_vec, params):
    """Pure-JAX reference replicating the PyTorch forward."""
    pos_mean = params["pos_embeddings"][pos_vec].mean(axis=1)
    lab_mean = params["lab_embeddings"][lab_vec].mean(axis=1)
    h = (
        word_vec @ params["W_word"] + params["b_word"]
        + pos_mean @ params["W_pos"] + params["b_pos"]
        + lab_mean @ params["W_lab"] + params["b_lab"]
    )
    y = jnp.maximum(h, 0.0)
    return y @ params["W_out"] + params["b_out"]


def init_params(key, embedding_dim, pos_dim, lab_dim, hidden_dim, out_dim,
                pos_dict_len, lab_dict_len):
    ks = jax.random.split(key, 10)
    scale = 0.1

    def w(k, shape):
        return (scale * jax.random.normal(k, shape)).astype(jnp.float32)

    return {
        "pos_embeddings": w(ks[0], (pos_dict_len, pos_dim)),
        "lab_embeddings": w(ks[1], (lab_dict_len, lab_dim)),
        "W_word": w(ks[2], (embedding_dim, hidden_dim)),
        "b_word": w(ks[3], (1, hidden_dim)),
        "W_pos": w(ks[4], (pos_dim, hidden_dim)),
        "b_pos": w(ks[5], (1, hidden_dim)),
        "W_lab": w(ks[6], (lab_dim, hidden_dim)),
        "b_lab": w(ks[7], (1, hidden_dim)),
        "W_out": w(ks[8], (hidden_dim, out_dim)),
        "b_out": w(ks[9], (1, out_dim)),
    }


if __name__ == "__main__":
    # Small, module-consistent shapes.
    B = 8              # batch
    E = 32             # embedding_dim (word vector dim)
    P = 16             # pos_dim
    L = 16             # lab_dim
    H = 32             # hidden_dim
    O = 16             # out_dim
    S = 8              # number of POS / label ids per example (mean'd over)
    POS_VOCAB = 20     # pos_dict_len
    LAB_VOCAB = 30     # lab_dict_len

    key = jax.random.PRNGKey(0)
    k_param, k_word, k_pos, k_lab = jax.random.split(key, 4)

    params = init_params(k_param, E, P, L, H, O, POS_VOCAB, LAB_VOCAB)
    # One-time fusion: embeddings folded through W_pos/W_lab, biases summed.
    # (compute_dtype=jnp.bfloat16 is the v6e/v7x fast path; demo keeps f32.)
    fused = fuse_params(params, compute_dtype=jnp.float32)

    word_vec = jax.random.normal(k_word, (B, E), dtype=jnp.float32)
    pos_vec = jax.random.randint(k_pos, (B, S), 0, POS_VOCAB, dtype=jnp.int32)
    lab_vec = jax.random.randint(k_lab, (B, S), 0, LAB_VOCAB, dtype=jnp.int32)

    out = action_predictor_forward(word_vec, pos_vec, lab_vec, fused)
    out = jax.block_until_ready(out)

    ref = _reference_forward(word_vec, pos_vec, lab_vec, params)
    assert out.shape == (B, O), out.shape
    assert jnp.allclose(out, ref, atol=1e-5, rtol=1e-5), (
        float(jnp.max(jnp.abs(out - ref)))
    )

    print("KERNEL_OK")
</pallas_src>

<mosaic_0001>
module attributes {stable_mosaic.version = 11 : i64} {
  func.func @_mlp_kernel(%arg0: i32, %arg1: memref<8x32xf32, #tpu.memory_space<vmem>>, %arg2: memref<8x20xf32, #tpu.memory_space<vmem>>, %arg3: memref<8x30xf32, #tpu.memory_space<vmem>>, %arg4: memref<32x32xf32, #tpu.memory_space<vmem>>, %arg5: memref<20x32xf32, #tpu.memory_space<vmem>>, %arg6: memref<30x32xf32, #tpu.memory_space<vmem>>, %arg7: memref<1x32xf32, #tpu.memory_space<vmem>>, %arg8: memref<32x16xf32, #tpu.memory_space<vmem>>, %arg9: memref<1x16xf32, #tpu.memory_space<vmem>>, %arg10: memref<8x16xf32, #tpu.memory_space<vmem>>) attributes {dimension_semantics = [#tpu.dimension_semantics<parallel>], iteration_bounds = array<i64: 1>, scalar_prefetch = 0 : i64, scratch_operands = 0 : i64, tpu.core_type = #tpu.core_type<tc>, window_params = [{transform_indices = @transform_0, window_bounds = array<i64: 8, 32>}, {transform_indices = @transform_1, window_bounds = array<i64: 8, 20>}, {transform_indices = @transform_2, window_bounds = array<i64: 8, 30>}, {pipeline_mode = #tpu.pipeline_mode<synchronous>, transform_indices = @transform_3, window_bounds = array<i64: 32, 32>}, {pipeline_mode = #tpu.pipeline_mode<synchronous>, transform_indices = @transform_4, window_bounds = array<i64: 20, 32>}, {pipeline_mode = #tpu.pipeline_mode<synchronous>, transform_indices = @transform_5, window_bounds = array<i64: 30, 32>}, {pipeline_mode = #tpu.pipeline_mode<synchronous>, transform_indices = @transform_6, window_bounds = array<i64: 1, 32>}, {pipeline_mode = #tpu.pipeline_mode<synchronous>, transform_indices = @transform_7, window_bounds = array<i64: 32, 16>}, {pipeline_mode = #tpu.pipeline_mode<synchronous>, transform_indices = @transform_8, window_bounds = array<i64: 1, 16>}, {transform_indices = @transform_9, window_bounds = array<i64: 8, 16>}]} {
    %c0 = arith.constant 0 : index
    %c0_0 = arith.constant 0 : index
    %0 = vector.load %arg1[%c0, %c0_0] : memref<8x32xf32, #tpu.memory_space<vmem>>, vector<8x32xf32>
    %c0_1 = arith.constant 0 : index
    %c0_2 = arith.constant 0 : index
    %1 = vector.load %arg4[%c0_1, %c0_2] : memref<32x32xf32, #tpu.memory_space<vmem>>, vector<32x32xf32>
    %cst = arith.constant dense<0.000000e+00> : vector<8x32xf32>
    %2 = tpu.matmul %0, %1, %cst {dimension_numbers = #tpu.dot_dimension_numbers<[1], [0], [0], [1], [0, 0, 1, 1], [], []>} : vector<8x32xf32>, vector<32x32xf32>, vector<8x32xf32> -> vector<8x32xf32>
    %c0_3 = arith.constant 0 : index
    %c0_4 = arith.constant 0 : index
    %3 = vector.load %arg2[%c0_3, %c0_4] : memref<8x20xf32, #tpu.memory_space<vmem>>, vector<8x20xf32>
    %c0_5 = arith.constant 0 : index
    %c0_6 = arith.constant 0 : index
    %4 = vector.load %arg5[%c0_5, %c0_6] : memref<20x32xf32, #tpu.memory_space<vmem>>, vector<20x32xf32>
    %cst_7 = arith.constant dense<0.000000e+00> : vector<8x32xf32>
    %5 = tpu.matmul %3, %4, %cst_7 {dimension_numbers = #tpu.dot_dimension_numbers<[1], [0], [0], [1], [0, 0, 1, 1], [], []>} : vector<8x20xf32>, vector<20x32xf32>, vector<8x32xf32> -> vector<8x32xf32>
    %6 = arith.addf %2, %5 : vector<8x32xf32>
    %c0_8 = arith.constant 0 : index
    %c0_9 = arith.constant 0 : index
    %7 = vector.load %arg3[%c0_8, %c0_9] : memref<8x30xf32, #tpu.memory_space<vmem>>, vector<8x30xf32>
    %c0_10 = arith.constant 0 : index
    %c0_11 = arith.constant 0 : index
    %8 = vector.load %arg6[%c0_10, %c0_11] : memref<30x32xf32, #tpu.memory_space<vmem>>, vector<30x32xf32>
    %cst_12 = arith.constant dense<0.000000e+00> : vector<8x32xf32>
    %9 = tpu.matmul %7, %8, %cst_12 {dimension_numbers = #tpu.dot_dimension_numbers<[1], [0], [0], [1], [0, 0, 1, 1], [], []>} : vector<8x30xf32>, vector<30x32xf32>, vector<8x32xf32> -> vector<8x32xf32>
    %10 = arith.addf %6, %9 : vector<8x32xf32>
    %c0_13 = arith.constant 0 : index
    %c0_14 = arith.constant 0 : index
    %11 = vector.load %arg7[%c0_13, %c0_14] : memref<1x32xf32, #tpu.memory_space<vmem>>, vector<1x32xf32>
    %12 = vector.broadcast %11 : vector<1x32xf32> to vector<8x32xf32>
    %13 = arith.addf %10, %12 : vector<8x32xf32>
    %cst_15 = arith.constant 0.000000e+00 : f32
    %14 = vector.broadcast %cst_15 : f32 to vector<8x32xf32>
    %15 = arith.maximumf %13, %14 : vector<8x32xf32>
    %c0_16 = arith.constant 0 : index
    %c0_17 = arith.constant 0 : index
    %16 = vector.load %arg8[%c0_16, %c0_17] : memref<32x16xf32, #tpu.memory_space<vmem>>, vector<32x16xf32>
    %cst_18 = arith.constant dense<0.000000e+00> : vector<8x16xf32>
    %17 = tpu.matmul %15, %16, %cst_18 {dimension_numbers = #tpu.dot_dimension_numbers<[1], [0], [0], [1], [0, 0, 1, 1], [], []>} : vector<8x32xf32>, vector<32x16xf32>, vector<8x16xf32> -> vector<8x16xf32>
    %c0_19 = arith.constant 0 : index
    %c0_20 = arith.constant 0 : index
    %18 = vector.load %arg9[%c0_19, %c0_20] : memref<1x16xf32, #tpu.memory_space<vmem>>, vector<1x16xf32>
    %19 = vector.broadcast %18 : vector<1x16xf32> to vector<8x16xf32>
    %20 = arith.addf %17, %19 : vector<8x16xf32>
    %c0_21 = arith.constant 0 : index
    %c0_22 = arith.constant 0 : index
    %21 = vector.load %arg10[%c0_21, %c0_22] : memref<8x16xf32, #tpu.memory_space<vmem>>, vector<8x16xf32>
    tpu.vector_store %arg10[%c0_21, %c0_22], %20 {strides = array<i32>} : memref<8x16xf32, #tpu.memory_space<vmem>>, vector<8x16xf32>,
    return
  }
  func.func @transform_0(%arg0: i32) -> (i32, i32) {
    %c0_i32 = arith.constant 0 : i32
    %c0_i32_0 = arith.constant 0 : i32
    return %arg0, %c0_i32 : i32, i32
  }
  func.func @transform_1(%arg0: i32) -> (i32, i32) {
    %c0_i32 = arith.constant 0 : i32
    %c0_i32_0 = arith.constant 0 : i32
    return %arg0, %c0_i32 : i32, i32
  }
  func.func @transform_2(%arg0: i32) -> (i32, i32) {
    %c0_i32 = arith.constant 0 : i32
    %c0_i32_0 = arith.constant 0 : i32
    return %arg0, %c0_i32 : i32, i32
  }
  func.func @transform_3(%arg0: i32) -> (i32, i32) {
    %c0_i32 = arith.constant 0 : i32
    %c0_i32_0 = arith.constant 0 : i32
    %c0_i32_1 = arith.constant 0 : i32
    return %c0_i32, %c0_i32_0 : i32, i32
  }
  func.func @transform_4(%arg0: i32) -> (i32, i32) {
    %c0_i32 = arith.constant 0 : i32
    %c0_i32_0 = arith.constant 0 : i32
    %c0_i32_1 = arith.constant 0 : i32
    return %c0_i32, %c0_i32_0 : i32, i32
  }
  func.func @transform_5(%arg0: i32) -> (i32, i32) {
    %c0_i32 = arith.constant 0 : i32
    %c0_i32_0 = arith.constant 0 : i32
    %c0_i32_1 = arith.constant 0 : i32
    return %c0_i32, %c0_i32_0 : i32, i32
  }
  func.func @transform_6(%arg0: i32) -> (i32, i32) {
    %c0_i32 = arith.constant 0 : i32
    %c0_i32_0 = arith.constant 0 : i32
    %c0_i32_1 = arith.constant 0 : i32
    return %c0_i32, %c0_i32_0 : i32, i32
  }
  func.func @transform_7(%arg0: i32) -> (i32, i32) {
    %c0_i32 = arith.constant 0 : i32
    %c0_i32_0 = arith.constant 0 : i32
    %c0_i32_1 = arith.constant 0 : i32
    return %c0_i32, %c0_i32_0 : i32, i32
  }
  func.func @transform_8(%arg0: i32) -> (i32, i32) {
    %c0_i32 = arith.constant 0 : i32
    %c0_i32_0 = arith.constant 0 : i32
    %c0_i32_1 = arith.constant 0 : i32
    return %c0_i32, %c0_i32_0 : i32, i32
  }
  func.func @transform_9(%arg0: i32) -> (i32, i32) {
    %c0_i32 = arith.constant 0 : i32
    %c0_i32_0 = arith.constant 0 : i32
    return %arg0, %c0_i32 : i32, i32
  }
}

</mosaic_0001>

<bundles_post_ra>
// kernel: tpu_custom_call.1
= control target key start
LH: loop header
LB: loop body
LE: loop exit
PB: predicated region body
PF: predicated region fallthrough
CT: control target
= control target key end

     0   :  { %14 = vsyncpa [#allocation3], 0  ;;  %s703_s0 = inlined_call_operand.vmem [shape: f32[8,32], index: 0, kind: input, shape index: {}]   ;;  %s704_s1 = inlined_call_operand.vmem [shape: f32[8,20], index: 1, kind: input, shape index: {}]   ;;  %s705_s2 = inlined_call_operand.hbm [shape: f32[8,30], index: 2, kind: input, shape index: {}]   ;;  %s706_s3 = inlined_call_operand.vmem [shape: f32[32,32], index: 3, kind: input, shape index: {}]   ;;  %s707_s4 = inlined_call_operand.hbm [shape: f32[20,32], index: 4, kind: input, shape index: {}]   ;;  %s708_s5 = inlined_call_operand.hbm [shape: f32[30,32], index: 5, kind: input, shape index: {}]   ;;  %s709_s6 = inlined_call_operand.vmem [shape: f32[1,32], index: 6, kind: input, shape index: {}]   ;;  %s710_s7 = inlined_call_operand.vmem [shape: f32[32,16], index: 7, kind: input, shape index: {}]   ;;  %s711_s8 = inlined_call_operand.vmem [shape: f32[1,16], index: 8, kind: input, shape index: {}]   ;;  %s712_s9 = inlined_call_operand.hbm [shape: f32[8,16], index: 9, kind: output, shape index: {}]  }
   0x1   :  { %15 = vsyncpa [#allocation6], 0 }
   0x2   :  { %16 = vsyncpa [#allocation4], 0  ;;  %s591_s30 = smov [#allocation5]  }
   0x3   :  { %s38_s10 = sshll.u32 %s591_s30, 4  ;;  %s39_s10 = int_to_ptr.vmem [resolvable:$true] %s38_s10 }
   0x4   :  { %s513_s11 = scalar_lea.vmem %s39_s10, 384  ;;  %p518_p1 = scmp.lt.s32.totalorder %s39_s10, %s39_s10 }
   0x5   :  { %p514_p0 = scmp.ne.s32.totalorder %s39_s10, %s513_s11  ;;  %p519_p2 = scmp.lt.s32.totalorder %s513_s11, %s513_s11 }
   0x7   :  { %p520_p3 = por %p519_p2, %p518_p1 }
   0x9   :  { %p521_p4 = pnand %p520_p3, %p514_p0 }
   0xb   :  { %524 = shalt.err (!%p521_p4)
}
   0xc   :  { %s592_s12 = smov 128   ;;  %s593_s13 = smov 8  }
   0xd   :  { %44 = dma.hbm_to_vmem [thread:$0]  %s707_s4, 384, %s39_s10, [#allocation6], %s592_s12, %s592_s12, %s593_s13  }
   0xe   :  { %s594_s16 = smov [#allocation2]   ;;  %s595_s18 = smov [#allocation7]  }
   0xf   :  { %s27_s17 = sshll.u32 %s594_s16, 4  ;;  %s50_s19 = sshll.u32 %s595_s18, 4  ;;  %s28_s17 = int_to_ptr.vmem [resolvable:$true] %s27_s17  ;;  %s51_s19 = int_to_ptr.vmem [resolvable:$true] %s50_s19 }
  0x10   :  { %s533_s20 = scalar_lea.vmem %s28_s17, 128  ;;  %p538_p6 = scmp.lt.s32.totalorder %s28_s17, %s28_s17 }
  0x11   :  { %p534_p5 = scmp.ne.s32.totalorder %s28_s17, %s533_s20  ;;  %p539_p7 = scmp.lt.s32.totalorder %s533_s20, %s533_s20 }
  0x13   :  { %p540_p8 = por %p539_p7, %p538_p6 }
  0x15   :  { %p541_p9 = pnand %p540_p8, %p534_p5 }
  0x17   :  { %544 = shalt.err (!%p541_p9)
}
  0x18   :  { %30 = dma.hbm_to_vmem [thread:$0]  %s705_s2, 128, %s28_s17, [#allocation3]  }
  0x19   :  { %s553_s23 = scalar_lea.vmem %s51_s19, 512  ;;  %p558_p11 = scmp.lt.s32.totalorder %s51_s19, %s51_s19 }
  0x1a   :  { %p554_p10 = scmp.ne.s32.totalorder %s51_s19, %s553_s23  ;;  %p559_p12 = scmp.lt.s32.totalorder %s553_s23, %s553_s23 }
  0x1c   :  { %p560_p13 = por %p559_p12, %p558_p11 }
  0x1e   :  { %p561_p0 = pnand %p560_p13, %p554_p10 }
  0x20   :  { %564 = shalt.err (!%p561_p0)
}
  0x21   :  { %56 = dma.hbm_to_vmem [thread:$0]  %s708_s5, 512, %s51_s19, [#allocation6], %s592_s12, %s592_s12, %s593_s13  }
  0x22   :  { %585 = dma.done.wait [#allocation3], 128  }
  0x23   :  { %586 = vsyncadd [#allocation3], 4294967168 }
  0x24   :  { %587 = dma.done.wait [#allocation6], 896  }
  0x25   :  { %588 = vsyncadd [#allocation6], 4294966400  ;;  %v596_v0 = vmov 0.0   ;;  %vm597_vm0 = vmmov 0   ;;  %vm85_vm1 = vcmask 1043456   ;;  %v76_v2 = vld [vmem:[%s706_s3 + $0x18] sm:$0xff] }
  0x26   :  { %455 = vmatprep.subr.mxu0 %v596_v0  ;;  %464 = vmatprep.subr.mxu1 %v596_v0  ;;  %v80_v1 = vld [vmem:[#allocation5 + $0x10] sm:$0xf]  ;;  %v79_v3 = vld [vmem:[#allocation5 + $0x8] sm:$0xff]  ;;  %v78_v5 = vld [vmem:[#allocation5] sm:$0xff]  ;;  %vm81_vm2 = vcmask 162816   ;;  %vm242_vm3 = vcmask 1045504  }
  0x27   :  { %461 = vmatprep.mubr.msk.f32.mxu0 %vm597_vm0, %v596_v0  ;;  %472 = vmatprep.mubr.msk.f32.mxu1 %vm597_vm0, %v596_v0  ;;  %v75_v4 = vld [vmem:[%s706_s3 + $0x10] sm:$0xff]  ;;  %v74_v6 = vld [vmem:[%s706_s3 + $0x8] sm:$0xff]  ;;  %v77_v7 = vld [vmem:[%s704_s1] sm:$0xff]  ;;  %vm159_vm4 = vcmask 261120   ;;  %vm238_vm5 = vcmask 244736   ;;  %vm410_vm6 = vcmask 130048  }
  0x28   :  { %456 = vmatpush3.msk.msra.mxu0 %vm85_vm1, %v80_v1  ;;  %465 = vmatpush3.msra.mxu1 %v76_v2  ;;  %v73_v8 = vld [vmem:[%s706_s3] sm:$0xff]  ;;  %v237_v9 = vld [vmem:[#allocation7 + $0x18] sm:$0x3f]  ;;  %v236_v11 = vld [vmem:[#allocation7 + $0x10] sm:$0xff] }
  0x29   :  { %457 = vmatprep.subr.mxu0 %v596_v0  ;;  %466 = vmatprep.subr.mxu1 %v596_v0  ;;  %v72_v10 = vld [vmem:[%s703_s0] sm:$0xff]  ;;  %v235_v12 = vld [vmem:[#allocation7 + $0x8] sm:$0xff]  ;;  %v329_v15 = vld [vmem:[%s710_s7 + $0x18] sm:$0xff] }
  0x2a   :  { %458 = vmatpush3.msra.mxu0 %v79_v3  ;;  %467 = vmatpush3.msra.mxu1 %v75_v4  ;;  %v234_v13 = vld [vmem:[#allocation7] sm:$0xff]  ;;  %v328_v16 = vld [vmem:[%s710_s7 + $0x10] sm:$0xff]  ;;  %v327_v17 = vld [vmem:[%s710_s7 + $0x8] sm:$0xff] }
  0x2b   :  { %459 = vmatprep.subr.mxu0 %v596_v0  ;;  %468 = vmatprep.subr.mxu1 %v596_v0  ;;  %v233_v14 = vld [vmem:[#allocation2] sm:$0xff] }
  0x2c   :  { %460 = vmatpush3.msra.mxu0 %v78_v5  ;;  %469 = vmatpush3.msra.mxu1 %v74_v6  ;;  %v326_v18 = vld [vmem:[%s710_s7] sm:$0xff]  ;;  %s598_s7 = smov [#allocation8]  }
  0x2d   :  { %462 = vmatmul.mubr.msk.f32.vlgmr.msra.gmra.mxu0 %vm81_vm2, %v77_v7  ;;  %470 = vmatprep.subr.mxu1 %v596_v0  ;;  %v433_v25 = vld [vmem:[%s709_s6] ss:$0 sm:$0xff]  ;;  %s418_s23 = sshll.u32 %s598_s7, 4  ;;  %s419_s23 = int_to_ptr.vmem [resolvable:$true] %s418_s23 }
  0x2e   :  { %475 = vmatprep.subr.mxu0 %v596_v0  ;;  %471 = vmatpush3.msra.mxu1 %v73_v8  ;;  %v434_v30 = vld [vmem:[%s711_s8] ss:$0 sm:$0xff]  ;;  %s565_s4 = scalar_lea.vmem %s419_s23, 128  ;;  %p570_p2 = scmp.lt.s32.totalorder %s419_s23, %s419_s23 }
  0x2f   :  { %476 = vmatpush3.msk.msra.mxu0 %vm242_vm3, %v237_v9  ;;  %473 = vmatmul.mubr.msk.f32.vlgmr.msra.gmra.mxu1 %vm159_vm4, %v72_v10  ;;  %p566_p1 = scmp.ne.s32.totalorder %s419_s23, %s565_s4  ;;  %p571_p3 = scmp.lt.s32.totalorder %s565_s4, %s565_s4 }
  0x30   :  { %477 = vmatprep.subr.mxu0 %v596_v0  ;;  %483 = vmatprep.mubr.msk.f32.mxu0 %vm597_vm0, %v596_v0 }
  0x31   :  { %478 = vmatpush3.msra.mxu0 %v236_v11  ;;  %486 = vmatprep.subr.mxu1 %v596_v0  ;;  %p572_p4 = por %p571_p3, %p570_p2 }
  0x32   :  { %479 = vmatprep.subr.mxu0 %v596_v0  ;;  %494 = vmatprep.mubr.msk.f32.mxu1 %vm597_vm0, %v596_v0 }
  0x33   :  { %480 = vmatpush3.msra.mxu0 %v235_v12  ;;  %487 = vmatpush3.msra.mxu1 %v329_v15  ;;  %p573_p5 = pnand %p572_p4, %p566_p1 }
  0x34   :  { %481 = vmatprep.subr.mxu0 %v596_v0  ;;  %488 = vmatprep.subr.mxu1 %v596_v0 }
  0x35   :  { %482 = vmatpush3.msra.mxu0 %v234_v13  ;;  %489 = vmatpush3.msra.mxu1 %v328_v16 }
  0x36   :  { %484 = vmatmul.mubr.msk.f32.vlgmr.msra.gmra.mxu0 %vm238_vm5, %v233_v14  ;;  %490 = vmatprep.subr.mxu1 %v596_v0 }
  0x37   :  { %491 = vmatpush3.msra.mxu1 %v327_v17 }
  0x38   :  { %492 = vmatprep.subr.mxu1 %v596_v0 }
  0x39   :  { %493 = vmatpush3.msra.mxu1 %v326_v18 }
  0xed   :  { %v155_v19 = vpop.f32.mrf.mxu0 }
  0xef   :  { %v463_v20 = vpop.f32.mrf.mxu0  ;;  %v229_v21 = vpop.f32.mrf.mxu1 }
  0xf0   :  { %v230_v23 = vadd.f32 %v229_v21, %v155_v19 }
  0xf1   :  { %v474_v22 = vpop.f32.mrf.mxu1 }
  0xf6   :  { %v312_v24 = vpop.f32.mrf.mxu0 }
  0xf7   :  { %v316_v26 = vadd.f32 %v312_v24, %v230_v23 }
  0xf8   :  { %v485_v27 = vpop.f32.mrf.mxu0 }
  0xf9   :  { %v324_v28 = vadd.f32 %v433_v25, %v316_v26 }
  0xfb   :  { %v325_v29 = vmax.f32 %v324_v28, 0.0 }
  0xfd   :  { %495 = vmatmul.mubr.msk.f32.vlgmr.msra.gmra.mxu1 %vm159_vm4, %v325_v29 }
 0x1bd   :  { %v406_v31 = vpop.f32.mrf.mxu1 }
 0x1be   :  { %v407_v32 = vadd.f32 %v434_v30, %v406_v31 }
 0x1bf   :  { %v496_v33 = vpop.f32.mrf.mxu1 }
 0x1c0   :  { %411 = vst.msk [vmem:[#allocation8] sm:$0xff] %vm410_vm6, %v407_v32 }
 0x1c1   :  { %576 = shalt.err (!%p573_p5)
}
 0x1c2   :  { %421 = dma.vmem_to_hbm [thread:$0]  %s419_s23, 128, %s712_s9, [#allocation4]  }
 0x1c3   :  { %589 = dma.done.wait [#allocation4], 128  }
 0x1c4   :  { %590 = vsyncadd [#allocation4], 4294967168 }
 0x1c5   :  { %425 = vsyncpa [#allocation3], 1 }
 0x1c6   :  { %426 = vsyncpa [#allocation6], 1 }
 0x1c7   :  { %427 = vsyncpa [#allocation4], 1 }

</bundles_post_ra>
